<compile_context>
chip_gen: v6e
topology: v6e:2x2x1
jax: 0.10.0
libtpu: 0.0.40
codegen_flags: <defaults>
</compile_context>

<pallas_src>
import jax
import jax.numpy as jnp
from jax.experimental import pallas as pl
from jax.experimental.pallas import tpu as pltpu

BN_EPS = 1e-5


def encoder_kernel(x_ref, w1_ref, gb_ref, w2b_ref, o_ref):
    # ---- Linear(F -> H): bf16 operands (x cast in-kernel), f32 MXU accumulation ----
    # (first Linear's bias intentionally omitted: cancelled by BN mean subtraction)
    x = x_ref[...].astype(jnp.bfloat16)                              # free VPU cast
    h = jnp.dot(x, w1_ref[...], preferred_element_type=jnp.float32)  # [B, H] f32

    # ---- BatchNorm1d(H), training mode: per-feature batch stats, biased variance,
    #      eps inside rsqrt.  Single sweep over h, fused into one scale/shift. ----
    gamma = gb_ref[0:1, :]                                           # [1, H]
    beta = gb_ref[1:2, :]                                            # [1, H]
    inv_b = 1.0 / h.shape[0]
    mean = jnp.sum(h, axis=0, keepdims=True) * inv_b                 # [1, H]
    mean_sq = jnp.sum(h * h, axis=0, keepdims=True) * inv_b          # [1, H]
    var = jnp.maximum(mean_sq - mean * mean, 0.0)                    # clamp: cancellation guard
    scale = gamma * jax.lax.rsqrt(var + BN_EPS)                      # [1, H]
    shift = beta - mean * scale                                      # [1, H]

    # ---- scale/shift + ReLU ----
    h = jnp.maximum(h * scale + shift, 0.0)

    # ---- Linear(H -> E), tiny, f32 ----
    hidden = w2b_ref.shape[0] - 1
    w2 = w2b_ref[0:hidden, :]                                        # [H, E]
    b2 = w2b_ref[hidden:hidden + 1, :]                               # [1, E]
    o_ref[...] = jnp.dot(h, w2, preferred_element_type=jnp.float32) + b2


def encoder_forward(x, w1_bf16, gb, w2b):
    B, F = x.shape
    H = w1_bf16.shape[1]
    E = w2b.shape[1]

    vmem = pl.BlockSpec(memory_space=pltpu.MemorySpace.VMEM)
    cost = pl.CostEstimate(
        flops=2 * B * F * H + 2 * B * H * E,
        transcendentals=H,  # rsqrt per hidden feature
        bytes_accessed=(x.size * 4            # f32 activations
                        + w1_bf16.size * 2    # bf16 weight
                        + gb.size * 4 + w2b.size * 4
                        + B * E * 4),         # f32 output
    )

    return pl.pallas_call(
        encoder_kernel,
        out_shape=jax.ShapeDtypeStruct((B, E), jnp.float32),
        in_specs=[vmem] * 4,
        out_specs=vmem,
        cost_estimate=cost,
    )(x, w1_bf16, gb, w2b)


def make_params(key, in_features=1000, hidden_channels=32, embedding_dim=16):
    k1, k2, k3, k4 = jax.random.split(key, 4)
    # PyTorch Linear init: U(-1/sqrt(fan_in), 1/sqrt(fan_in)); deterministic here.
    lim1 = 1.0 / (in_features ** 0.5)
    lim2 = 1.0 / (hidden_channels ** 0.5)
    w1 = jax.random.uniform(k1, (in_features, hidden_channels), jnp.float32, -lim1, lim1)
    b1 = jax.random.uniform(k2, (1, hidden_channels), jnp.float32, -lim1, lim1)
    w2 = jax.random.uniform(k3, (hidden_channels, embedding_dim), jnp.float32, -lim2, lim2)
    b2 = jax.random.uniform(k4, (1, embedding_dim), jnp.float32, -lim2, lim2)
    # BatchNorm1d default affine init: gamma=1, beta=0
    gamma = jnp.ones((1, hidden_channels), jnp.float32)
    beta = jnp.zeros((1, hidden_channels), jnp.float32)
    return w1, b1, gamma, beta, w2, b2


def prep_params(w1, gamma, beta, w2, b2):
    # ONE-TIME parameter prep (not per forward call):
    #  * cast the largest weight to bf16 (halves its per-call HBM traffic),
    #  * pack gamma/beta and w2/b2 so the kernel takes 4 inputs instead of 6.
    w1_bf16 = w1.astype(jnp.bfloat16)
    gb = jnp.concatenate([gamma, beta], axis=0)    # [2, H]
    w2b = jnp.concatenate([w2, b2], axis=0)        # [H+1, E]
    return w1_bf16, gb, w2b


def reference_forward(x, w1, b1, gamma, beta, w2, b2):
    # Pure-JAX reference of the PyTorch module, evaluated on the SAME bf16-quantized
    # x/w1 the kernel's first matmul consumes (the bf16 cast is this implementation's
    # quantization choice, not a semantic change).  b1 IS included here — it must be
    # cancelled by the train-mode BN mean subtraction, which is exactly what the
    # kernel exploits by dropping it.
    xq = x.astype(jnp.bfloat16)
    w1q = w1.astype(jnp.bfloat16)
    h = jnp.dot(xq, w1q, preferred_element_type=jnp.float32) + b1
    mean = h.mean(axis=0, keepdims=True)
    var = ((h - mean) ** 2).mean(axis=0, keepdims=True)   # biased, two-pass
    h = (h - mean) / jnp.sqrt(var + BN_EPS)
    h = h * gamma + beta
    h = jnp.maximum(h, 0.0)
    return jnp.dot(h, w2, preferred_element_type=jnp.float32) + b2


if __name__ == "__main__":
    B, F, H, E = 8, 1000, 32, 16
    key = jax.random.PRNGKey(0)
    kx, kp = jax.random.split(key)
    x = jax.random.normal(kx, (B, F), jnp.float32)
    w1, b1, gamma, beta, w2, b2 = make_params(kp, F, H, E)

    # One-time prep (would be done once at model-build time, amortized over calls).
    w1_bf16, gb, w2b = prep_params(w1, gamma, beta, w2, b2)

    out = encoder_forward(x, w1_bf16, gb, w2b)
    out = jax.block_until_ready(out)

    ref = reference_forward(x, w1, b1, gamma, beta, w2, b2)
    assert out.shape == (B, E)
    assert jnp.allclose(out, ref, atol=5e-4, rtol=5e-4), "mismatch vs pure-JAX reference"
    print("KERNEL_OK")
</pallas_src>

<mosaic_0001>
module attributes {stable_mosaic.version = 11 : i64} {
  func.func @encoder_kernel(%arg0: memref<8x1000xf32, #tpu.memory_space<vmem>>, %arg1: memref<1000x32xbf16, #tpu.memory_space<vmem>>, %arg2: memref<2x32xf32, #tpu.memory_space<vmem>>, %arg3: memref<33x16xf32, #tpu.memory_space<vmem>>, %arg4: memref<8x16xf32, #tpu.memory_space<vmem>>) attributes {dimension_semantics = [], scalar_prefetch = 0 : i64, scratch_operands = 0 : i64, tpu.core_type = #tpu.core_type<tc>} {
    %c0 = arith.constant 0 : index
    %c0_0 = arith.constant 0 : index
    %0 = vector.load %arg0[%c0, %c0_0] : memref<8x1000xf32, #tpu.memory_space<vmem>>, vector<8x1000xf32>
    %1 = arith.truncf %0 : vector<8x1000xf32> to vector<8x1000xbf16>
    %c0_1 = arith.constant 0 : index
    %c0_2 = arith.constant 0 : index
    %2 = vector.load %arg1[%c0_1, %c0_2] : memref<1000x32xbf16, #tpu.memory_space<vmem>>, vector<1000x32xbf16>
    %cst = arith.constant dense<0.000000e+00> : vector<8x32xf32>
    %3 = tpu.matmul %1, %2, %cst {dimension_numbers = #tpu.dot_dimension_numbers<[1], [0], [0], [1], [0, 0, 1, 1], [], []>} : vector<8x1000xbf16>, vector<1000x32xbf16>, vector<8x32xf32> -> vector<8x32xf32>
    %c0_3 = arith.constant 0 : index
    %c0_4 = arith.constant 0 : index
    %4 = vector.load %arg2[%c0_3, %c0_4] : memref<2x32xf32, #tpu.memory_space<vmem>>, vector<1x32xf32>
    %c1 = arith.constant 1 : index
    %c0_5 = arith.constant 0 : index
    %5 = vector.load %arg2[%c1, %c0_5] : memref<2x32xf32, #tpu.memory_space<vmem>>, vector<1x32xf32>
    %cst_6 = arith.constant dense<0.000000e+00> : vector<32xf32>
    %6 = vector.multi_reduction <add>, %3, %cst_6 [0] : vector<8x32xf32> to vector<32xf32>
    %7 = vector.shape_cast %6 : vector<32xf32> to vector<1x32xf32>
    %cst_7 = arith.constant 1.250000e-01 : f32
    %8 = vector.broadcast %cst_7 : f32 to vector<1x32xf32>
    %9 = arith.mulf %7, %8 : vector<1x32xf32>
    %10 = arith.mulf %3, %3 : vector<8x32xf32>
    %cst_8 = arith.constant dense<0.000000e+00> : vector<32xf32>
    %11 = vector.multi_reduction <add>, %10, %cst_8 [0] : vector<8x32xf32> to vector<32xf32>
    %12 = vector.shape_cast %11 : vector<32xf32> to vector<1x32xf32>
    %cst_9 = arith.constant 1.250000e-01 : f32
    %13 = vector.broadcast %cst_9 : f32 to vector<1x32xf32>
    %14 = arith.mulf %12, %13 : vector<1x32xf32>
    %15 = arith.mulf %9, %9 : vector<1x32xf32>
    %16 = arith.subf %14, %15 : vector<1x32xf32>
    %cst_10 = arith.constant 0.000000e+00 : f32
    %17 = vector.broadcast %cst_10 : f32 to vector<1x32xf32>
    %18 = arith.maximumf %16, %17 : vector<1x32xf32>
    %cst_11 = arith.constant 9.99999974E-6 : f32
    %19 = vector.broadcast %cst_11 : f32 to vector<1x32xf32>
    %20 = arith.addf %18, %19 : vector<1x32xf32>
    %21 = math.rsqrt %20 : vector<1x32xf32>
    %22 = arith.mulf %4, %21 : vector<1x32xf32>
    %23 = arith.mulf %9, %22 : vector<1x32xf32>
    %24 = arith.subf %5, %23 : vector<1x32xf32>
    %25 = vector.broadcast %22 : vector<1x32xf32> to vector<8x32xf32>
    %26 = arith.mulf %3, %25 : vector<8x32xf32>
    %27 = vector.broadcast %24 : vector<1x32xf32> to vector<8x32xf32>
    %28 = arith.addf %26, %27 : vector<8x32xf32>
    %cst_12 = arith.constant 0.000000e+00 : f32
    %29 = vector.broadcast %cst_12 : f32 to vector<8x32xf32>
    %30 = arith.maximumf %28, %29 : vector<8x32xf32>
    %c0_13 = arith.constant 0 : index
    %c0_14 = arith.constant 0 : index
    %31 = vector.load %arg3[%c0_13, %c0_14] : memref<33x16xf32, #tpu.memory_space<vmem>>, vector<32x16xf32>
    %c32 = arith.constant 32 : index
    %c0_15 = arith.constant 0 : index
    %32 = vector.load %arg3[%c32, %c0_15] : memref<33x16xf32, #tpu.memory_space<vmem>>, vector<1x16xf32>
    %cst_16 = arith.constant dense<0.000000e+00> : vector<8x16xf32>
    %33 = tpu.matmul %30, %31, %cst_16 {dimension_numbers = #tpu.dot_dimension_numbers<[1], [0], [0], [1], [0, 0, 1, 1], [], []>} : vector<8x32xf32>, vector<32x16xf32>, vector<8x16xf32> -> vector<8x16xf32>
    %34 = vector.broadcast %32 : vector<1x16xf32> to vector<8x16xf32>
    %35 = arith.addf %33, %34 : vector<8x16xf32>
    %c0_17 = arith.constant 0 : index
    %c0_18 = arith.constant 0 : index
    %36 = vector.load %arg4[%c0_17, %c0_18] : memref<8x16xf32, #tpu.memory_space<vmem>>, vector<8x16xf32>
    tpu.vector_store %arg4[%c0_17, %c0_18], %35 {strides = array<i32>} : memref<8x16xf32, #tpu.memory_space<vmem>>, vector<8x16xf32>,
    return
  }
}

</mosaic_0001>

<bundles_post_ra>
// kernel: tpu_custom_call.1
= control target key start
LH: loop header
LB: loop body
LE: loop exit
PB: predicated region body
PF: predicated region fallthrough
CT: control target
= control target key end

     0   :  { %v1079_v41 = vmov 0   ;;  %vm539_vm0 = vcmask 1043456   ;;  %vm535_vm1 = vcmask 850944   ;;  %s1363_s0 = inlined_call_operand.vmem [shape: f32[8,1000], index: 0, kind: input, shape index: {}]   ;;  %s1364_s1 = inlined_call_operand.vmem [shape: bf16[1000,32], index: 1, kind: input, shape index: {}]   ;;  %s1365_s2 = inlined_call_operand.vmem [shape: f32[2,32], index: 2, kind: input, shape index: {}]   ;;  %s1366_s3 = inlined_call_operand.vmem [shape: f32[33,16], index: 3, kind: input, shape index: {}]   ;;  %s1367_s4 = inlined_call_operand.hbm [shape: f32[8,16], index: 4, kind: output, shape index: {}]  }
   0x1   :  { %v992_v0 = vld [vmem:[%s1364_s1 + $0x78] sm:$0xff]   ;;  %v996_v4 = vld [vmem:[%s1364_s1 + $0x70] sm:$0xff]   ;;  %v1000_v8 = vld [vmem:[%s1364_s1 + $0x68] sm:$0xff]  }
   0x2   :  { %v993_v1 = vld [vmem:[%s1364_s1 + $0xf8] sm:$0xff]   ;;  %906 = vmatprep.subr.bf16.mxu0 %v992_v0  ;;  %v997_v5 = vld [vmem:[%s1364_s1 + $0xf0] sm:$0xff]   ;;  %v1001_v9 = vld [vmem:[%s1364_s1 + $0xe8] sm:$0xff]  }
   0x3   :  { %v994_v2 = vld [vmem:[%s1364_s1 + $0x38] sm:$0xff]   ;;  %928 = vmatprep.subr.bf16.mxu1 %v993_v1  ;;  %v998_v6 = vld [vmem:[%s1364_s1 + $0x30] sm:$0xff]   ;;  %v1002_v10 = vld [vmem:[%s1364_s1 + $0x28] sm:$0xff]  }
   0x4   :  { %v995_v3 = vld [vmem:[%s1364_s1 + $0xb8] sm:$0xff]   ;;  %907 = vmatpush3.bf16.msra.mxu0 %v994_v2  ;;  %v999_v7 = vld [vmem:[%s1364_s1 + $0xb0] sm:$0xff]   ;;  %v1003_v11 = vld [vmem:[%s1364_s1 + $0xa8] sm:$0xff]  }
   0x5   :  { %929 = vmatpush3.bf16.msra.mxu1 %v995_v3  ;;  %908 = vmatprep.subr.bf16.mxu0 %v996_v4  ;;  %v1004_v12 = vld [vmem:[%s1364_s1 + $0x60] sm:$0xff]   ;;  %v1008_v16 = vld [vmem:[%s1364_s1 + $0x58] sm:$0xff]   ;;  %v1012_v20 = vld [vmem:[%s1364_s1 + $0x50] sm:$0xff]  }
   0x6   :  { %930 = vmatprep.subr.bf16.mxu1 %v997_v5  ;;  %v1005_v13 = vld [vmem:[%s1364_s1 + $0xe0] sm:$0xff]   ;;  %v1009_v17 = vld [vmem:[%s1364_s1 + $0xd8] sm:$0xff]   ;;  %v1013_v21 = vld [vmem:[%s1364_s1 + $0xd0] sm:$0xff]  }
   0x7   :  { %v1006_v14 = vld [vmem:[%s1364_s1 + $0x20] sm:$0xff]   ;;  %v1010_v18 = vld [vmem:[%s1364_s1 + $0x18] sm:$0xff]   ;;  %v1014_v22 = vld [vmem:[%s1364_s1 + $0x10] sm:$0xff]  }
   0x8   :  { %909 = vmatpush3.bf16.msra.mxu0 %v998_v6  ;;  %v1007_v15 = vld [vmem:[%s1364_s1 + $0xa0] sm:$0xff]   ;;  %v1011_v19 = vld [vmem:[%s1364_s1 + $0x98] sm:$0xff]   ;;  %v1015_v23 = vld [vmem:[%s1364_s1 + $0x90] sm:$0xff]  }
   0x9   :  { %931 = vmatpush3.bf16.msra.mxu1 %v999_v7  ;;  %910 = vmatprep.subr.bf16.mxu0 %v1000_v8  ;;  %v1016_v24 = vld [vmem:[%s1364_s1 + $0x48] sm:$0xff]   ;;  %v1020_v28 = vld [vmem:[%s1364_s1 + $0x40] sm:$0xff]   ;;  %v22_v33 = vld [vmem:[%s1363_s0 + $0x18] sm:$0xff] }
   0xa   :  { %932 = vmatprep.subr.bf16.mxu1 %v1001_v9  ;;  %v1017_v25 = vld [vmem:[%s1364_s1 + $0xc8] sm:$0xff]   ;;  %v1021_v29 = vld [vmem:[%s1364_s1 + $0xc0] sm:$0xff]   ;;  %v30_v36 = vpack.c.bf16 %v22_v33, %v22_v33  ;;  %v21_v38 = vld [vmem:[%s1363_s0 + $0x10] sm:$0xff] }
   0xb   :  { %v1018_v26 = vld [vmem:[%s1364_s1 + $0x8] sm:$0xff]   ;;  %v1022_v30 = vld [vmem:[%s1364_s1] sm:$0xff]   ;;  %v29_v39 = vpack.c.bf16 %v21_v38, %v21_v38  ;;  %v1024_v40 = vld [vmem:[%s1364_s1 + $0x178] sm:$0xff]  }
   0xc   :  { %911 = vmatpush3.bf16.msra.mxu0 %v1002_v10  ;;  %v1019_v27 = vld [vmem:[%s1364_s1 + $0x88] sm:$0xff]   ;;  %v1023_v31 = vld [vmem:[%s1364_s1 + $0x80] sm:$0xff]   ;;  %615 = vmatprep.mubr.bf16.mxu1 %v30_v36  ;;  %v1025_v42 = vld [vmem:[%s1364_s1 + $0x138] sm:$0xff]  }
   0xd   :  { %933 = vmatpush3.bf16.msra.mxu1 %v1003_v11  ;;  %912 = vmatprep.subr.bf16.mxu0 %v1004_v12  ;;  %v20_v32 = vld [vmem:[%s1363_s0 + $0x8] sm:$0xff]  ;;  %v19_v34 = vld [vmem:[%s1363_s0] sm:$0xff]  ;;  %v1026_v43 = vld [vmem:[%s1364_s1 + $0x1b8] sm:$0xff]  }
   0xe   :  { %934 = vmatprep.subr.bf16.mxu1 %v1005_v13  ;;  %v28_v35 = vpack.c.bf16 %v20_v32, %v20_v32  ;;  %v27_v37 = vpack.c.bf16 %v19_v34, %v19_v34  ;;  %v1027_v44 = vld [vmem:[%s1364_s1 + $0x170] sm:$0xff]   ;;  %v1030_v47 = vld [vmem:[%s1364_s1 + $0x168] sm:$0xff]   ;;  %v1033_v50 = vld [vmem:[%s1364_s1 + $0x160] sm:$0xff]  }
   0xf   :  { %v1028_v45 = vld [vmem:[%s1364_s1 + $0x130] sm:$0xff]   ;;  %v1031_v48 = vld [vmem:[%s1364_s1 + $0x128] sm:$0xff]   ;;  %v1034_v51 = vld [vmem:[%s1364_s1 + $0x120] sm:$0xff]  }
  0x10   :  { %913 = vmatpush3.bf16.msra.mxu0 %v1006_v14  ;;  %575 = vmatprep.mubr.bf16.mxu0 %v28_v35  ;;  %v1029_v46 = vld [vmem:[%s1364_s1 + $0x1b0] sm:$0xff]   ;;  %v1032_v49 = vld [vmem:[%s1364_s1 + $0x1a8] sm:$0xff]   ;;  %v1035_v52 = vld [vmem:[%s1364_s1 + $0x1a0] sm:$0xff]  }
  0x11   :  { %935 = vmatpush3.bf16.msra.mxu1 %v1007_v15  ;;  %914 = vmatprep.subr.bf16.mxu0 %v1008_v16  ;;  %v1036_v53 = vld [vmem:[%s1364_s1 + $0x158] sm:$0xff]   ;;  %v1039_v56 = vld [vmem:[%s1364_s1 + $0x150] sm:$0xff]   ;;  %v1042_v59 = vld [vmem:[%s1364_s1 + $0x148] sm:$0xff]  }
  0x12   :  { %936 = vmatprep.subr.bf16.mxu1 %v1009_v17  ;;  %v1037_v54 = vld [vmem:[%s1364_s1 + $0x118] sm:$0xff]   ;;  %v1040_v57 = vld [vmem:[%s1364_s1 + $0x110] sm:$0xff]   ;;  %v1043_v60 = vld [vmem:[%s1364_s1 + $0x108] sm:$0xff]  }
  0x13   :  { %v1038_v55 = vld [vmem:[%s1364_s1 + $0x198] sm:$0xff]   ;;  %v1041_v58 = vld [vmem:[%s1364_s1 + $0x190] sm:$0xff]   ;;  %v24_v61 = vld [vmem:[%s1363_s0 + $0x28] sm:$0xff] }
  0x14   :  { %915 = vmatpush3.bf16.msra.mxu0 %v1010_v18  ;;  %v1044_v62 = vld [vmem:[%s1364_s1 + $0x188] sm:$0xff]   ;;  %v32_v63 = vpack.c.bf16 %v24_v61, %v24_v61  ;;  %v1045_v0 = vld [vmem:[%s1364_s1 + $0x140] sm:$0xff]   ;;  %v1048_v4 = vld [vmem:[%s1364_s1 + $0x1f0] ss:$0 sps:$4 sm:$0xff]  }
  0x15   :  { %937 = vmatpush3.bf16.msra.mxu1 %v1011_v19  ;;  %916 = vmatprep.subr.bf16.mxu0 %v1012_v20  ;;  %v1046_v1 = vld [vmem:[%s1364_s1 + $0x100] sm:$0xff]   ;;  %v26_v5 = vld [vmem:[%s1363_s0 + $0x38] sm:$0xff] }
  0x16   :  { %938 = vmatprep.subr.bf16.mxu1 %v1013_v21  ;;  %v1047_v2 = vld [vmem:[%s1364_s1 + $0x180] sm:$0xff]   ;;  %v34_v7 = vpack.c.bf16 %v26_v5, %v26_v5 }
  0x17   :  { %v23_v3 = vld [vmem:[%s1363_s0 + $0x20] sm:$0xff] }
  0x18   :  { %917 = vmatpush3.bf16.msra.mxu0 %v1014_v22  ;;  %v31_v6 = vpack.c.bf16 %v23_v3, %v23_v3 }
  0x19   :  { %939 = vmatpush3.bf16.msra.mxu1 %v1015_v23  ;;  %918 = vmatprep.subr.bf16.mxu0 %v1016_v24 }
  0x1a   :  { %940 = vmatprep.subr.bf16.mxu1 %v1017_v25 }
  0x1c   :  { %919 = vmatpush3.bf16.msra.mxu0 %v1018_v26 }
  0x1d   :  { %941 = vmatpush3.bf16.msra.mxu1 %v1019_v27  ;;  %920 = vmatprep.subr.bf16.mxu0 %v1020_v28 }
  0x1e   :  { %942 = vmatprep.subr.bf16.mxu1 %v1021_v29 }
  0x20   :  { %921 = vmatpush3.bf16.msra.mxu0 %v1022_v30 }
  0x21   :  { %943 = vmatpush3.bf16.msra.mxu1 %v1023_v31  ;;  %950 = vmatprep.subr.bf16.mxu0 %v1024_v40 }
  0x22   :  { %663 = vmatprep.subr.bf16.mxu1 %v1079_v41 }
  0x23   :  { %576 = vmatmul.mubr.bf16.vlgmr.msra.gmra.mxu0 %v27_v37 }
  0x24   :  { %616 = vmatmul.mubr.bf16.vlgmr.msra.gmra.mxu1 %v29_v39  ;;  %951 = vmatpush3.bf16.msra.mxu0 %v1025_v42 }
  0x25   :  { %664 = vmatpush1.bf16.msra.mxu1 %v1026_v43  ;;  %952 = vmatprep.subr.bf16.mxu0 %v1027_v44 }
  0x26   :  { %665 = vmatprep.subr.bf16.mxu1 %v1079_v41  ;;  %655 = vmatprep.mubr.bf16.mxu0 %v32_v63 }
  0x28   :  { %953 = vmatpush3.bf16.msra.mxu0 %v1028_v45 }
  0x29   :  { %666 = vmatpush1.bf16.msra.mxu1 %v1029_v46  ;;  %954 = vmatprep.subr.bf16.mxu0 %v1030_v47 }
  0x2a   :  { %667 = vmatprep.subr.bf16.mxu1 %v1079_v41 }
  0x2c   :  { %955 = vmatpush3.bf16.msra.mxu0 %v1031_v48 }
  0x2d   :  { %668 = vmatpush1.bf16.msra.mxu1 %v1032_v49  ;;  %956 = vmatprep.subr.bf16.mxu0 %v1033_v50 }
  0x2e   :  { %669 = vmatprep.subr.bf16.mxu1 %v1079_v41 }
  0x30   :  { %957 = vmatpush3.bf16.msra.mxu0 %v1034_v51 }
  0x31   :  { %670 = vmatpush1.bf16.msra.mxu1 %v1035_v52  ;;  %958 = vmatprep.subr.bf16.mxu0 %v1036_v53 }
  0x32   :  { %671 = vmatprep.subr.bf16.mxu1 %v1079_v41 }
  0x34   :  { %959 = vmatpush3.bf16.msra.mxu0 %v1037_v54 }
  0x35   :  { %672 = vmatpush1.bf16.msra.mxu1 %v1038_v55  ;;  %960 = vmatprep.subr.bf16.mxu0 %v1039_v56 }
  0x36   :  { %673 = vmatprep.subr.bf16.mxu1 %v1079_v41 }
  0x38   :  { %961 = vmatpush3.bf16.msra.mxu0 %v1040_v57 }
  0x39   :  { %674 = vmatpush1.bf16.msra.mxu1 %v1041_v58  ;;  %962 = vmatprep.subr.bf16.mxu0 %v1042_v59 }
  0x3a   :  { %675 = vmatprep.subr.bf16.mxu1 %v1079_v41 }
  0x3c   :  { %963 = vmatpush3.bf16.msra.mxu0 %v1043_v60 }
  0x3d   :  { %676 = vmatpush1.bf16.msra.mxu1 %v1044_v62  ;;  %964 = vmatprep.subr.bf16.mxu0 %v1045_v0 }
  0x3e   :  { %677 = vmatprep.subr.bf16.mxu1 %v1079_v41 }
  0x3f   :  { %9 = vsyncpa [#allocation3], 0  ;;  %v541_v8 = vsel %vm539_vm0, %v1048_v4, 0  ;;  %903 = vmatprep.mubr.msk.bf16.mxu1 %vm535_vm1, %v34_v7  ;;  %v1049_v9 = vld [vmem:[%s1364_s1 + $0x1e8] sm:$0xff]   ;;  %v1050_v10 = vld [vmem:[%s1364_s1 + $0x1e0] sm:$0xff]   ;;  %v1080_v17 = vmov 0.0  }
  0x40   :  { %965 = vmatpush3.bf16.msra.mxu0 %v1046_v1  ;;  %v1051_v11 = vld [vmem:[%s1364_s1 + $0x1d8] sm:$0xff]   ;;  %v1052_v12 = vld [vmem:[%s1364_s1 + $0x1d0] sm:$0xff]   ;;  %v1053_v13 = vld [vmem:[%s1364_s1 + $0x1c8] sm:$0xff]   ;;  %vm1081_vm2 = vmmov 0   ;;  %vm705_vm3 = vcmask 261120   ;;  %v731_v1 = vlaneseq  ;;  %s1082_s13 = smov [#allocation2]  }
  0x41   :  { %678 = vmatpush1.bf16.msra.mxu1 %v1047_v2  ;;  %v1054_v14 = vld [vmem:[%s1364_s1 + $0x1c0] sm:$0xff]   ;;  %v25_v15 = vld [vmem:[%s1363_s0 + $0x30] sm:$0xff]  ;;  %977 = vmatprep.subr.mxu0 %v1080_v17  ;;  %v745_v18 = vld [vmem:[%s1366_s3 + $0x18] sm:$0xff]  ;;  %s832_s14 = sshll.u32 %s1082_s13, 4  ;;  %vm824_vm4 = vcmask 130048   ;;  %s833_s14 = int_to_ptr.vmem [resolvable:$true] %s832_s14 }
  0x42   :  { %681 = vmatprep.subr.bf16.mxu1 %v1079_v41  ;;  %v33_v16 = vpack.c.bf16 %v25_v15, %v25_v15  ;;  %v744_v19 = vld [vmem:[%s1366_s3 + $0x10] sm:$0xff]  ;;  %v743_v20 = vld [vmem:[%s1366_s3 + $0x8] sm:$0xff]  ;;  %v742_v21 = vld [vmem:[%s1366_s3] sm:$0xff]  ;;  %v732_v2 = vshrl.u32 %v731_v1, 7  ;;  %p1062_p1 = scmp.lt.s32.totalorder %s833_s14, %s833_s14 }
  0x43   :  { %656 = vmatmul.mubr.bf16.vlgmr.msra.gmra.mxu0 %v31_v6  ;;  %v703_v3 = vld [vmem:[%s1365_s2] sm:$0x1]  ;;  %v704_v7 = vld [vmem:[%s1365_s2 + $0x1] sm:$0x1]  ;;  %s1057_s2 = scalar_lea.vmem %s833_s14, 128 }
  0x44   :  { %978 = vmatpush3.msra.mxu0 %v745_v18  ;;  %985 = vmatprep.mubr.msk.f32.mxu0 %vm1081_vm2, %v1080_v17  ;;  %v733_v4 = vsub.s32 0, %v732_v2  ;;  %v904_v15 = vld [vmem:[%s1366_s3 + $0x20] ss:$0 sm:$0xff]  ;;  %p1058_p0 = scmp.ne.s32.totalorder %s833_s14, %s1057_s2  ;;  %p1063_p2 = scmp.lt.s32.totalorder %s1057_s2, %s1057_s2 }
  0x45   :  { %682 = vmatpush2.bf16.msra.mxu1 %v541_v8  ;;  %979 = vmatprep.subr.mxu0 %v1080_v17 }
  0x46   :  { %683 = vmatprep.subr.bf16.mxu1 %v1079_v41  ;;  %980 = vmatpush3.msra.mxu0 %v744_v19  ;;  %p1064_p3 = por %p1063_p2, %p1062_p1 }
  0x47   :  { %981 = vmatprep.subr.mxu0 %v1080_v17 }
  0x48   :  { %982 = vmatpush3.msra.mxu0 %v743_v20  ;;  %p1065_p4 = pnand %p1064_p3, %p1058_p0 }
  0x49   :  { %684 = vmatpush2.bf16.msra.mxu1 %v1049_v9  ;;  %983 = vmatprep.subr.mxu0 %v1080_v17 }
  0x4a   :  { %685 = vmatprep.subr.bf16.mxu1 %v1079_v41  ;;  %984 = vmatpush3.msra.mxu0 %v742_v21 }
  0x4d   :  { %686 = vmatpush2.bf16.msra.mxu1 %v1050_v10 }
  0x4e   :  { %687 = vmatprep.subr.bf16.mxu1 %v1079_v41 }
  0x51   :  { %688 = vmatpush2.bf16.msra.mxu1 %v1051_v11 }
  0x52   :  { %689 = vmatprep.subr.bf16.mxu1 %v1079_v41 }
  0x55   :  { %690 = vmatpush2.bf16.msra.mxu1 %v1052_v12 }
  0x56   :  { %691 = vmatprep.subr.bf16.mxu1 %v1079_v41 }
  0x59   :  { %692 = vmatpush2.bf16.msra.mxu1 %v1053_v13 }
  0x5a   :  { %693 = vmatprep.subr.bf16.mxu1 %v1079_v41 }
  0x5d   :  { %694 = vmatpush2.bf16.msra.mxu1 %v1054_v14 }
  0x60   :  { %696 = vmatmul.mubr.bf16.vlgmr.msra.gmra.mxu1 %v33_v16 }
  0xe3   :  { %v922_v22 = vpop.f32.mrf.mxu0 }
  0xe4   :  { %v944_v23 = vpop.f32.mrf.mxu1 }
  0xe5   :  { %v923_v24 = vpop.f32.mrf.mxu0 }
  0xe6   :  { %v945_v25 = vpop.f32.mrf.mxu1  ;;  %v924_v34 = vadd.f32 %v923_v24, %v922_v22 }
  0xe7   :  { %v925_v27 = vpop.f32.mrf.mxu0  ;;  %v946_v35 = vadd.f32 %v945_v25, %v944_v23 }
  0xe8   :  { %v947_v26 = vpop.f32.mrf.mxu1 }
  0xe9   :  { %v926_v29 = vpop.f32.mrf.mxu0  ;;  %v618_v37 = vadd.f32 %v946_v35, %v924_v34 }
  0xea   :  { %v948_v28 = vpop.f32.mrf.mxu1 }
 0x103   :  { %v966_v30 = vpop.f32.mrf.mxu0 }
 0x105   :  { %v967_v31 = vpop.f32.mrf.mxu0 }
 0x106   :  { %v968_v36 = vadd.f32 %v967_v31, %v966_v30 }
 0x107   :  { %v969_v32 = vpop.f32.mrf.mxu0 }
 0x108   :  { %v658_v38 = vadd.f32 %v968_v36, %v618_v37 }
 0x109   :  { %v970_v33 = vpop.f32.mrf.mxu0 }
 0x120   :  { %v697_v39 = vpop.f32.mrf.mxu1 }
 0x121   :  { %v698_v40 = vadd.f32 %v697_v39, %v658_v38 }
 0x122   :  { %v699_v41 = vpop.f32.mrf.mxu1 }
 0x123   :  { %v706_v42 = vsel %vm705_vm3, %v698_v40, 0.0  ;;  %v714_v43 = vmul.f32 %v698_v40, %v698_v40 }
 0x124   :  { %v707_v44 = vrot.slane %v706_v42, 4  ;;  %v700_v45 = vpop.f32.mrf.mxu1 }
 0x125   :  { %v715_v46 = vsel %vm705_vm3, %v714_v43, 0.0 }
 0x126   :  { %v708_v47 = vadd.f32 %v707_v44, %v706_v42  ;;  %v716_v48 = vrot.slane %v715_v46, 4  ;;  %v701_v49 = vpop.f32.mrf.mxu1 }
 0x128   :  { %v709_v50 = vrot.slane %v708_v47, 2  ;;  %v717_v51 = vadd.f32 %v716_v48, %v715_v46 }
 0x12a   :  { %v710_v52 = vadd.f32 %v709_v50, %v708_v47  ;;  %v718_v53 = vrot.slane %v717_v51, 2 }
 0x12c   :  { %v711_v54 = vrot.slane %v710_v52, 1  ;;  %v719_v55 = vadd.f32 %v718_v53, %v717_v51 }
 0x12e   :  { %v712_v56 = vadd.f32 %v711_v54, %v710_v52  ;;  %v720_v57 = vrot.slane %v719_v55, 1 }
 0x130   :  { %v713_v58 = vmul.f32 0.125, %v712_v56  ;;  %v721_v59 = vadd.f32 %v720_v57, %v719_v55 }
 0x132   :  { %v722_v60 = vmul.f32 0.125, %v721_v59  ;;  %v723_v61 = vmul.f32 %v713_v58, %v713_v58 }
 0x134   :  { %v724_v62 = vsub.f32 %v722_v60, %v723_v61 }
 0x136   :  { %v725_v63 = vmax.f32 %v724_v62, 0.0 }
 0x138   :  { %v726_v0 = vadd.f32 1e-05, %v725_v63 }
 0x13a   :  { %1055 = vrsqrt.f32 %v726_v0 }
 0x147   :  { %v1056_v5 = vpop.eup %1055 }
 0x148   :  { %v728_v6 = vmul.f32 %v1056_v5, %v703_v3 }
 0x14a   :  { %v729_v8 = vmul.f32 %v728_v6, %v713_v58  ;;  %v734_v9 = vrot.slane %v728_v6, %v733_v4 }
 0x14c   :  { %v730_v10 = vsub.f32 %v704_v7, %v729_v8  ;;  %v735_v11 = vmul.f32 %v734_v9, %v698_v40 }
 0x14e   :  { %v739_v12 = vrot.slane %v730_v10, %v733_v4 }
 0x150   :  { %v740_v13 = vadd.f32 %v739_v12, %v735_v11 }
 0x152   :  { %v741_v14 = vmax.f32 %v740_v13, 0.0 }
 0x154   :  { %986 = vmatmul.mubr.msk.f32.vlgmr.msra.gmra.mxu0 %vm705_vm3, %v741_v14 }
 0x214   :  { %v820_v16 = vpop.f32.mrf.mxu0 }
 0x215   :  { %v821_v17 = vadd.f32 %v904_v15, %v820_v16 }
 0x216   :  { %v987_v18 = vpop.f32.mrf.mxu0 }
 0x217   :  { %825 = vst.msk [vmem:[#allocation2] sm:$0xff] %vm824_vm4, %v821_v17 }
 0x218   :  { %1068 = shalt.err (!%p1065_p4)
}
 0x219   :  { %835 = dma.vmem_to_hbm [thread:$0]  %s833_s14, 128, %s1367_s4, [#allocation3]  }
 0x21a   :  { %1077 = dma.done.wait [#allocation3], 128  }
 0x21b   :  { %1078 = vsyncadd [#allocation3], 4294967168 }
 0x21c   :  { %839 = vsyncpa [#allocation3], 1 }

</bundles_post_ra>
